<compile_context>
chip_gen: v6e
topology: v6e:2x2x1
jax: 0.10.0
libtpu: 0.0.40
codegen_flags: <defaults>
</compile_context>

<pallas_src>
import jax
import jax.numpy as jnp
from jax.experimental import pallas as pl
from jax.experimental.pallas import tpu as pltpu


def _round_up(n, m):
    return ((n + m - 1) // m) * m


def _sublane_multiple(dtype):
    # Native (sublane, 128) tile: 8 rows for 32-bit, 16 for bf16, 32 for int8.
    return max(8, 32 // jnp.dtype(dtype).itemsize)


def _vmem_capacity_bytes():
    try:
        info = pltpu.get_tpu_info()
        cap = getattr(info, "vmem_capacity_bytes", None)
        if cap:
            return int(cap)
    except Exception:
        pass
    return 64 * 1024 * 1024  # conservative fallback: v7x per-TC VMEM


def _linear_svm_kernel(x_ref, w_ref, b_ref, o_ref):
    # x_ref: (TB, F) VMEM   w_ref: (1, F) VMEM   b_ref: (1, 1) SMEM   o_ref: (TB, 1)
    # Promote to f32 before multiply/reduce: exact accumulation for bf16/int8
    # inputs; the casts ride on VALU slack (kernel is HBM-bandwidth bound).
    x = x_ref[...].astype(jnp.float32)              # (TB, F)
    w = w_ref[...].astype(jnp.float32)              # (1, F), broadcasts over rows
    y = jnp.sum(x * w, axis=-1, keepdims=True)      # (TB, 1) f32, XLU lane reduce
    o_ref[...] = (y + b_ref[0, 0]).astype(o_ref.dtype)


def linear_svm_forward(x, weight, bias, *, max_tile_rows=None):
    """x: (B, F); weight: (1, F); bias: (1,). Returns (B, 1) = x @ W^T + b."""
    B, F = x.shape
    itemsize = jnp.dtype(x.dtype).itemsize
    row_bytes = F * itemsize
    sub = _sublane_multiple(x.dtype)

    # Per-generation VMEM sizing: bigger double-buffered x budget on 128 MiB
    # chips (v5e/v6e), v7x-safe numbers on 64 MiB chips.
    vmem_cap = _vmem_capacity_bytes()
    if vmem_cap >= 128 * 1024 * 1024:
        x_budget = 48 * 1024 * 1024     # total bytes for the 2x-buffered x stream
        vmem_limit = 96 * 1024 * 1024
    else:
        x_budget = 24 * 1024 * 1024
        vmem_limit = 48 * 1024 * 1024

    # Tile rows chosen by byte budget, clamped to the (sublane-rounded) batch.
    rows_cap = max(sub, (x_budget // (2 * row_bytes)) // sub * sub)
    tb = min(rows_cap, _round_up(B, sub))
    if max_tile_rows is not None:
        tb = min(tb, max(sub, (max_tile_rows // sub) * sub))
    tb = max(sub, tb)

    # VMEM actually required: double-buffered x tile + double-buffered,
    # sublane-padded weight + slack for the tiny output.  Guards the wide-F
    # edge case where even a minimal tile would blow past the default limit.
    w_itemsize = jnp.dtype(weight.dtype).itemsize
    needed = 2 * tb * row_bytes + 2 * 8 * F * w_itemsize + (1 << 20)
    vmem_limit = int(min(max(vmem_limit, needed),
                         max(vmem_cap - (4 << 20), 32 * 1024 * 1024)))
    # TODO(synk): if `needed` still exceeds physical VMEM (F in the millions),
    # switch to a feature-axis ("arbitrary") grid with a (TB, 1) f32 accumulator.

    bias2d = bias.reshape(1, 1).astype(jnp.float32)

    out = pl.pallas_call(
        _linear_svm_kernel,
        out_shape=jax.ShapeDtypeStruct((B, 1), x.dtype),
        grid_spec=pltpu.PrefetchScalarGridSpec(
            num_scalar_prefetch=0,
            grid=(pl.cdiv(B, tb),),                                 # ragged last block OK
            in_specs=[
                pl.BlockSpec((tb, F), lambda i: (i, 0)),            # x: streamed tiles
                pl.BlockSpec((1, F), lambda i: (0, 0)),             # weight: resident
                pl.BlockSpec(memory_space=pltpu.MemorySpace.SMEM),  # bias: SMEM scalar
            ],
            out_specs=pl.BlockSpec((tb, 1), lambda i: (i, 0)),
        ),
        compiler_params=pltpu.CompilerParams(
            dimension_semantics=("parallel",),
            vmem_limit_bytes=vmem_limit,
        ),
    )(x, weight, bias2d)

    return out


if __name__ == "__main__":
    # Small shapes consistent with the module; B is NOT a multiple of the tile
    # so the ragged (masked) last block path is exercised.
    B, IN_FEATURES = 30, 32

    key = jax.random.PRNGKey(0)
    kx, kw, kb = jax.random.split(key, 3)

    # Deterministic parameter init (uniform, like nn.Linear's default range).
    bound = 1.0 / (IN_FEATURES ** 0.5)
    weight = jax.random.uniform(kw, (1, IN_FEATURES), jnp.float32, -bound, bound)
    bias = jax.random.uniform(kb, (1,), jnp.float32, -bound, bound)
    x = jax.random.normal(kx, (B, IN_FEATURES), jnp.float32)

    ref = x @ weight.T + bias

    # Small tile -> multi-step pipelined path (grid of 4 x 8-row tiles) with a
    # ragged 6-row final block.
    out = jax.block_until_ready(linear_svm_forward(x, weight, bias, max_tile_rows=8))
    assert out.shape == (B, 1)
    assert jnp.allclose(out, ref, atol=1e-5, rtol=1e-5)

    # Default byte-budgeted tiling path (single block covering the whole batch).
    out2 = jax.block_until_ready(linear_svm_forward(x, weight, bias))
    assert out2.shape == (B, 1)
    assert jnp.allclose(out2, ref, atol=1e-5, rtol=1e-5)

    print("KERNEL_OK")
</pallas_src>

<mosaic_0001>
module attributes {stable_mosaic.version = 11 : i64} {
  func.func @_linear_svm_kernel(%arg0: i32, %arg1: memref<8x32xf32, #tpu.memory_space<vmem>>, %arg2: memref<1x32xf32, #tpu.memory_space<vmem>>, %arg3: memref<1x1xf32, #tpu.memory_space<smem>>, %arg4: memref<8x1xf32, #tpu.memory_space<vmem>>) attributes {dimension_semantics = [#tpu.dimension_semantics<parallel>], iteration_bounds = array<i64: 4>, scalar_prefetch = 0 : i64, scratch_operands = 0 : i64, tpu.core_type = #tpu.core_type<tc>, window_params = [{transform_indices = @transform_0, window_bounds = array<i64: 8, 32>}, {pipeline_mode = #tpu.pipeline_mode<synchronous>, transform_indices = @transform_1, window_bounds = array<i64: 1, 32>}, {transform_indices = @transform_2, window_bounds = array<i64: 1, 1>}, {transform_indices = @transform_3, window_bounds = array<i64: 8, 1>}]} {
    %c0 = arith.constant 0 : index
    %c0_0 = arith.constant 0 : index
    %0 = vector.load %arg1[%c0, %c0_0] : memref<8x32xf32, #tpu.memory_space<vmem>>, vector<8x32xf32>
    %c0_1 = arith.constant 0 : index
    %c0_2 = arith.constant 0 : index
    %1 = vector.load %arg2[%c0_1, %c0_2] : memref<1x32xf32, #tpu.memory_space<vmem>>, vector<1x32xf32>
    %2 = vector.broadcast %1 : vector<1x32xf32> to vector<8x32xf32>
    %3 = arith.mulf %0, %2 : vector<8x32xf32>
    %cst = arith.constant dense<0.000000e+00> : vector<8xf32>
    %4 = vector.multi_reduction <add>, %3, %cst [1] : vector<8x32xf32> to vector<8xf32>
    %5 = vector.shape_cast %4 : vector<8xf32> to vector<8x1xf32>
    %c0_3 = arith.constant 0 : index
    %c0_4 = arith.constant 0 : index
    %6 = memref.load %arg3[%c0_3, %c0_4] : memref<1x1xf32, #tpu.memory_space<smem>>
    %7 = vector.broadcast %6 : f32 to vector<8x1xf32>
    %8 = arith.addf %5, %7 : vector<8x1xf32>
    %c0_5 = arith.constant 0 : index
    %c0_6 = arith.constant 0 : index
    %9 = vector.load %arg4[%c0_5, %c0_6] : memref<8x1xf32, #tpu.memory_space<vmem>>, vector<8x1xf32>
    tpu.vector_store %arg4[%c0_5, %c0_6], %8 {strides = array<i32>} : memref<8x1xf32, #tpu.memory_space<vmem>>, vector<8x1xf32>,
    return
  }
  func.func @transform_0(%arg0: i32) -> (i32, i32) {
    %c0_i32 = arith.constant 0 : i32
    %c0_i32_0 = arith.constant 0 : i32
    return %arg0, %c0_i32 : i32, i32
  }
  func.func @transform_1(%arg0: i32) -> (i32, i32) {
    %c0_i32 = arith.constant 0 : i32
    %c0_i32_0 = arith.constant 0 : i32
    %c0_i32_1 = arith.constant 0 : i32
    return %c0_i32, %c0_i32_0 : i32, i32
  }
  func.func @transform_2(%arg0: i32) -> (i32, i32) {
    %c0_i32 = arith.constant 0 : i32
    %c0_i32_0 = arith.constant 0 : i32
    %c0_i32_1 = arith.constant 0 : i32
    return %c0_i32, %c0_i32_0 : i32, i32
  }
  func.func @transform_3(%arg0: i32) -> (i32, i32) {
    %c0_i32 = arith.constant 0 : i32
    %c0_i32_0 = arith.constant 0 : i32
    return %arg0, %c0_i32 : i32, i32
  }
}

</mosaic_0001>

<bundles_post_ra>
// kernel: tpu_custom_call.1
= control target key start
LH: loop header
LB: loop body
LE: loop exit
PB: predicated region body
PF: predicated region fallthrough
CT: control target
= control target key end

     0   :  { %s511_s0 = inlined_call_operand.hbm [shape: f32[30,32], index: 0, kind: input, shape index: {}]   ;;  %s512_s1 = inlined_call_operand.vmem [shape: f32[1,32], index: 1, kind: input, shape index: {}]   ;;  %s513_s2 = inlined_call_operand.<no memory space> [shape: f32[1,1], index: 2, kind: input, shape index: {}]   ;;  %s514_s3 = inlined_call_operand.vmem [shape: f32[30,1], index: 3, kind: output, shape index: {}]  }
   0x1   :  { %8 = sst [smem:[#allocation2]] %s513_s2 }
   0x2   :  { %9 = vsyncpa [#allocation4], 0 }
   0x3   :  { %11 = vsyncpa [#allocation4 + $0x1], 0  ;;  %s408_s14 = smov 0   ;;  %s410_s15 = smov 0  }
   0x4   :  { %s412_s16 = smov 0   ;;  %s414_s17 = smov 0  }
   0x5 LB: > { %s427_s2 = sadd.s32 4294967295, %s382_s17   ;;  %s430_s18 = sadd.s32 1, %s382_s17   ;;  %s382_s17 = sphi %s414_s17, %s524_s17   ;;  %s378_s16 = sphi %s412_s16, %s523_s16   ;;  %s374_s15 = sphi %s410_s15, %s522_s15   ;;  %s370_s14 = sphi %s408_s14, %s521_s14  }
   0x6   : > { %s21_s19 = ssub.s32 %s382_s17, %s430_s18  ;;  %s24_s20 = sadd.s32 1, %s378_s16 }
   0x7   : > { %p22_p0 = scmp.eq.s32.totalorder %s21_s19, 0  ;;  %p31_p1 = scmp.ne.s32.totalorder %s378_s16, %s374_s15 }
   0x8   : > { %p32_p2 = scmp.eq.s32.totalorder %s382_s17, 0  ;;  %p37_p3 = scmp.ne.s32.totalorder %s374_s15, %s370_s14 }
   0x9   : > { %s440_s21 = scalar_select %p22_p0, %s378_s16, %s24_s20  }
   0xa   : > { %p33_p4 = por %p32_p2, %p31_p1  ;;  %p38_p5 = scmp.eq.s32.totalorder %s427_s2, 0 }
   0xb   : > { %p287_p6 = scmp.lt.s32.totalorder %s382_s17, 4  ;;  %s135_s23 = sand.u32 1, %s378_s16  }
   0xc   : > { %p444_p7 = por %p38_p5, %p37_p3  ;;  %s273_s24 = sshll.u32 %s135_s23, 3 }
   0xd   : > { %s274_s25 = sshll.u32 %s382_s17, 7  ;;  %s139_s29 = scalar_lea.vmem [#allocation3], %s273_s24 }
   0xe   : > { %s516_s22 = scalar_select %p444_p7, 1, 0 }
   0xf   : > { %s453_s28 = scalar_lea.hbm %s511_s0, %s274_s25  ;;  %s146_s30 = sshll.u32 %s139_s29, 4  ;;  %s455_s30 = int_to_ptr.vmem [resolvable:$true] %s146_s30 }
  0x10   : > { %p457_p8 = pnand %p287_p6, %p33_p4  ;;  %s136_s5 = scalar_lea.sflag [#allocation4], %s135_s23 }
  0x11   : > { %s320_s6 = scalar_lea.hbm %s453_s28, 128  ;;  %s325_s9 = scalar_lea.hbm %s511_s0, 512 }
  0x12   : > { %p321_p11 = scmp.ne.s32.totalorder %s453_s28, %s320_s6  ;;  %p322_p12 = pneg %p457_p8 }
  0x13   : > { %p326_p1 = scmp.lt.s32.totalorder %s453_s28, %s511_s0  ;;  %p327_p2 = scmp.lt.s32.totalorder %s325_s9, %s320_s6 }
  0x14   : > { %p323_p13 = pnand %p322_p12, %p321_p11 }
  0x15   : > { %p328_p3 = por %p327_p2, %p326_p1 }
  0x16   : > { %p324_p0 = pneg %p323_p13 }
  0x18   : > { %p329_p4 = pnand %p328_p3, %p324_p0 }
  0x1a   : > { %332 = shalt.err (!%p329_p4)
}
  0x1b   : > { %s333_s12 = scalar_lea.vmem %s455_s30, 128  ;;  %s384_s13 = smov [#allocation3]  }
  0x1c   : > { %p334_p5 = scmp.ne.s32.totalorder %s455_s30, %s333_s12  ;;  %s338_s14 = sshll.u32 %s384_s13, 4  ;;  %s339_s14 = int_to_ptr.vmem [resolvable:$false] %s338_s14 }
  0x1d   : > { %s340_s19 = scalar_lea.vmem %s339_s14, 256  ;;  %p341_p13 = scmp.lt.s32.totalorder %s455_s30, %s339_s14 }
  0x1e   : > { %p336_p6 = pnand %p334_p5, %p322_p12  ;;  %p342_p9 = scmp.lt.s32.totalorder %s340_s19, %s333_s12 }
  0x20   : > { %p337_p11 = pneg %p336_p6  ;;  %p343_p10 = por %p342_p9, %p341_p13 }
  0x22   : > { %p344_p7 = pnand %p343_p10, %p337_p11 }
  0x24   : > { %347 = shalt.err (!%p344_p7)
}
  0x25   : > { %286 = dma.hbm_to_vmem [thread:$0]  (!%p457_p8), %s453_s28, 128, %s455_s30, %s136_s5  }
  0x26   : > { %p518_p0 = scmp.lt.s32.totalorder %s382_s17, 5  ;;  %p519_p1 = scmp.ge.s32.totalorder %s382_s17, 1 }
  0x28   : > { %p152_p12 = pnand %p519_p1, %p518_p0 }
  0x29   : > { %s157_s20 = sand.u32 (!%p152_p12), 1, %s374_s15   ;;  %p520_p9 = scmp.ne.s32.totalorder (!%p152_p12), %s516_s22, 0 }
  0x2a   : > { %155 = sbr.rel (%p152_p12) target bundleno = 194 (0xc2), region = 32  ;;  %s276_s23 = sshll.u32 (!%p152_p12), %s157_s20, 3 }
  0x2b   : > { %s158_s24 = scalar_lea.sflag (!%p152_p12), [#allocation4], %s157_s20  ;;  %s161_s25 = scalar_lea.vmem (!%p152_p12), [#allocation3], %s276_s23 }
  0x2f   : > { %365 = dma.done.wait (%p520_p9), %s158_s24, 128  }
  0x30   : > { %367 = vsyncadd (%p520_p9), %s158_s24, 4294967168  ;;  %v187_v0 = vld [vmem:[%s161_s25] sm:$0xff]  ;;  %vm196_vm0 = vcmask 261120   ;;  %p183_p7 = scmp.lt.s32.totalorder %s427_s2, 3  ;;  %s200_s17 = sld [smem:[#allocation2]]  ;;  %vm203_vm1 = vcmask 7168  }
  0x31   : > { %v278_v1 = vld [vmem:[%s512_s1] ss:$0 sm:$0xff] }
  0x32   : > { %v195_v2 = vmul.f32 %v278_v1, %v187_v0  ;;  %s526_s2 = smov (!%p183_p7, %s427_s2), 3 }
  0x33   : > { %s277_s28 = sshll.u32 %s526_s2, 3 }
  0x34   : > { %v197_v3 = vsel %vm196_vm0, %v195_v2, 0.0  ;;  %s186_s22 = scalar_lea.vmem %s514_s3, %s277_s28 }
  0x35   : > { %198 = vadd.xlane.f32.xlu0 %v197_v3 }
  0x36   : > { %v201_v4 = vstv %s200_s17 }
  0xbe   : > { %v199_v5 = vpop.xlane.xlu0 %198 }
  0xbf   : > { %v202_v6 = vadd.f32 %v201_v4, %v199_v5 }
  0xc1   : > { %204 = vst.msk [vmem:[%s186_s22] sm:$0xff] %vm203_vm1, %v202_v6 }
  0xc2 PF: > { %p14_p8 = scmp.ge.s32.totalorder %s430_s18, 6   ;;  %s521_s14 = smov %s374_s15 }
  0xc3   : > { %s522_s15 = smov %s378_s16  ;;  %s523_s16 = smov %s440_s21 }
  0xc4   : > { %s524_s17 = smov %s430_s18  ;;  %16 = sbr.rel (!%p14_p8) target bundleno = 5 (0x5), region = 72 }
  0xc9   :  { %224 = vsyncpa [#allocation4], 1 }
  0xca   :  { %226 = vsyncpa [#allocation4 + $0x1], 1 }

</bundles_post_ra>
